<compile_context>
chip_gen: v5e
topology: v5e:2x2
jax: 0.10.0
libtpu: 0.0.40
codegen_flags: <defaults>
</compile_context>

<pallas_src>
import functools
import math

import jax
import jax.numpy as jnp
from jax.experimental import pallas as pl
from jax.experimental.pallas import tpu as pltpu

N_LANES_OUT = 8                       # "1o" (3 lanes) padded to 8 (= full out dim -> legal block)
TILE_M_CAP = 1024                     # max row tile feeding the MXU
VMEM_X_BUDGET = 20 * 1024 * 1024      # budget for double-buffered x tiles (fits v5e/v6e/v7x)
VMEM_LIMIT_BYTES = 32 * 1024 * 1024   # scoped VMEM limit (raises v5e's 16 MiB default)


def _cdiv(a, b):
    return -(-a // b)


def _round_up(x, m):
    return _cdiv(x, m) * m


def _choose_tm(m):
    """Row tile: as large as possible, but keep >= 2 row tiles so v7x megacore is used."""
    tm = min(TILE_M_CAP, _round_up(max(_cdiv(m, 2), 1), 8))
    return max(tm, 8)


def _active_column_range(irreps_in):
    """[c_lo, c_hi) column span covering every l=1 block of the flat feature vector."""
    off, c_lo, c_hi = 0, None, 0
    for mul, ell in irreps_in:
        dim = mul * (2 * ell + 1)
        if ell == 1 and mul > 0:
            if c_lo is None:
                c_lo = off
            c_hi = off + dim
        off += dim
    return c_lo, c_hi, off


def build_readout_weight_matrix(weight_1o, irreps_in, n_lanes=N_LANES_OUT):
    """Build the [dim_in, n_lanes] f32 matrix realizing o3.Linear(irreps_in -> '1o').

    Flat-feature layout matches e3nn/MACE: each (mul, l) block occupies mul*(2l+1)
    consecutive columns, channel-major.  Only l=1 blocks get nonzero rows:
        W[offset + 3*c + m, m] = weight_1o[c_global] / sqrt(num_1o_channels)
    ("element" path normalization: every 1o->1o path divided by sqrt of the total 1o fan-in).
    0e / l!=1 rows stay zero (no such path exists in o3.Linear).
    """
    # TODO(synk): non-default e3nn options (path_normalization="path", biases, shared weights)
    # are not modeled; default o3.Linear construction only.
    num_1o = sum(mul for mul, ell in irreps_in if ell == 1)
    blocks, wi = [], 0
    for mul, ell in irreps_in:
        dim = mul * (2 * ell + 1)
        if ell == 1:
            wc = weight_1o[wi:wi + mul].astype(jnp.float32)
            blk = (wc[:, None, None] * jnp.eye(3, dtype=jnp.float32)[None]).reshape(mul * 3, 3)
            wi += mul
        else:
            blk = jnp.zeros((dim, 3), jnp.float32)
        blocks.append(blk)
    w = jnp.concatenate(blocks, axis=0) / math.sqrt(float(max(num_1o, 1)))
    return jnp.pad(w, ((0, 0), (0, n_lanes - 3)))   # tiny (K x 8), kept in f32


def _readout_kernel(x_ref, w_ref, o_ref):
    """Single-K-block path: one f32 MXU matmul per row tile, stored directly."""
    o_ref[...] = jnp.dot(x_ref[...], w_ref[...], preferred_element_type=jnp.float32)


def _readout_kernel_ktiled(x_ref, w_ref, o_ref, acc_ref, *, k_total, tk):
    """Huge-K fallback: K-tiled matmul with an f32 VMEM accumulator."""
    j = pl.program_id(1)

    @pl.when(j == 0)
    def _():
        acc_ref[...] = jnp.zeros_like(acc_ref)

    x = x_ref[...]
    if k_total % tk != 0:
        # Ragged last K block: zero the out-of-range columns (W rows there are zero-padded).
        col = jax.lax.broadcasted_iota(jnp.int32, x.shape, 1) + j * tk
        x = jnp.where(col < k_total, x, 0.0)

    acc_ref[...] += jnp.dot(x, w_ref[...], preferred_element_type=jnp.float32)

    @pl.when(j == pl.num_programs(1) - 1)
    def _():
        o_ref[...] = acc_ref[...]


def linear_vector_readout_padded(x_flat, weight_1o, irreps_in):
    """LinearVectorReadoutBlock forward, returning the lane-padded [N, 8] slab (cols 0..2 valid)."""
    m, k = x_flat.shape
    c_lo, c_hi, dim_total = _active_column_range(irreps_in)
    assert dim_total == k, "irreps_in inconsistent with flat feature dim"
    if c_lo is None:
        # No l=1 inputs: o3.Linear('... -> 1o') has no paths, output is zero.
        return jnp.zeros((m, N_LANES_OUT), jnp.float32)

    w_full = build_readout_weight_matrix(weight_1o, irreps_in)   # (k, 8) f32

    # 128-aligned K window covering every l=1 block: columns outside it are never read from HBM.
    k_lo = (c_lo // 128) * 128
    k_hi = min(_round_up(c_hi, 128), k)
    kw = k_hi - k_lo
    # Legality of a single offset block: width multiple of 128 and start multiple of the width.
    if k_lo > 0 and not (kw % 128 == 0 and k_lo % kw == 0):
        k_lo, kw = 0, k_hi   # keep only the tail skip (always a legal single block)

    tm = _choose_tm(m)
    if 2 * tm * kw * 4 > VMEM_X_BUDGET:
        tm_fit = (VMEM_X_BUDGET // (2 * kw * 4)) // 8 * 8
        if tm_fit >= 256:
            tm = min(tm, tm_fit)

    if 2 * tm * kw * 4 <= VMEM_X_BUDGET:
        # ---------------- common path: single K block, no accumulator ----------------
        k_blk = k_lo // kw
        w_win = w_full[k_lo:k_lo + kw]          # tiny slice of a tiny array
        grid = (_cdiv(m, tm),)
        return pl.pallas_call(
            _readout_kernel,
            out_shape=jax.ShapeDtypeStruct((m, N_LANES_OUT), jnp.float32),
            grid_spec=pltpu.PrefetchScalarGridSpec(
                num_scalar_prefetch=0,
                grid=grid,
                in_specs=[
                    pl.BlockSpec((tm, kw), lambda i: (i, k_blk)),
                    pl.BlockSpec((kw, N_LANES_OUT), lambda i: (0, 0)),
                ],
                out_specs=pl.BlockSpec((tm, N_LANES_OUT), lambda i: (i, 0)),
            ),
            compiler_params=pltpu.CompilerParams(
                dimension_semantics=("parallel",),
                vmem_limit_bytes=VMEM_LIMIT_BYTES),
        )(x_flat, w_win)

    # ---------------- huge-K fallback: K-tiled with f32 VMEM accumulator ----------------
    tm = min(_choose_tm(m), 512)
    tk = max(128, (VMEM_X_BUDGET // (2 * tm * 4)) // 128 * 128)
    k_pad = _round_up(k, tk)
    w_pad = jnp.pad(w_full, ((0, k_pad - k), (0, 0)))   # zero rows beyond K
    grid = (_cdiv(m, tm), _cdiv(k, tk))
    kernel = functools.partial(_readout_kernel_ktiled, k_total=k, tk=tk)
    return pl.pallas_call(
        kernel,
        out_shape=jax.ShapeDtypeStruct((m, N_LANES_OUT), jnp.float32),
        grid_spec=pltpu.PrefetchScalarGridSpec(
            num_scalar_prefetch=0,
            grid=grid,
            in_specs=[
                pl.BlockSpec((tm, tk), lambda i, j: (i, j)),
                pl.BlockSpec((tk, N_LANES_OUT), lambda i, j: (j, 0)),
            ],
            out_specs=pl.BlockSpec((tm, N_LANES_OUT), lambda i, j: (i, 0)),
            scratch_shapes=[pltpu.VMEM((tm, N_LANES_OUT), jnp.float32)],
        ),
        compiler_params=pltpu.CompilerParams(
            dimension_semantics=("parallel", "arbitrary"),
            vmem_limit_bytes=VMEM_LIMIT_BYTES),
    )(x_flat, w_pad)


def linear_vector_readout(x_flat, weight_1o, irreps_in):
    """Forward of LinearVectorReadoutBlock: [N, dim_in] -> [N, 3].

    Perf-sensitive callers should consume linear_vector_readout_padded's (N, 8) slab and fuse
    the 3-lane slice into the next op; the slice here is a separate (now 16x cheaper) XLA copy.
    """
    return linear_vector_readout_padded(x_flat, weight_1o, irreps_in)[:, :3]


if __name__ == "__main__":
    key = jax.random.PRNGKey(0)
    k_x, k_w = jax.random.split(key)

    # irreps_in = 32x0e + 32x1o (MACE-style hidden irreps) -> flat feature dim = 32 + 96 = 128
    irreps_in = ((32, 0), (32, 1))
    num_nodes = 512
    dim_in = sum(mul * (2 * ell + 1) for mul, ell in irreps_in)
    num_1o = sum(mul for mul, ell in irreps_in if ell == 1)

    x = jax.random.normal(k_x, (num_nodes, dim_in), jnp.float32)
    weight_1o = jax.random.normal(k_w, (num_1o,), jnp.float32)   # e3nn init: N(0, 1)

    fwd = jax.jit(functools.partial(linear_vector_readout, irreps_in=irreps_in))
    out = fwd(x, weight_1o)
    jax.block_until_ready(out)
    assert out.shape == (num_nodes, 3)

    # Pure-JAX reference: path-normalized weighted sum over the l=1 channels only.
    ref = jnp.zeros((num_nodes, 3), jnp.float32)
    off, wi = 0, 0
    for mul, ell in irreps_in:
        dim = mul * (2 * ell + 1)
        if ell == 1:
            blk = x[:, off:off + dim].reshape(num_nodes, mul, 3)
            ref = ref + (blk * weight_1o[wi:wi + mul][None, :, None]).sum(axis=1)
            wi += mul
        off += dim
    ref = ref / math.sqrt(float(num_1o))

    max_err = float(jnp.max(jnp.abs(out - ref)))
    assert jnp.allclose(out, ref, rtol=5e-2, atol=5e-2), f"max abs err {max_err}"
    print("KERNEL_OK")
</pallas_src>

<mosaic_0001>
module attributes {stable_mosaic.version = 11 : i64} {
  func.func @_readout_kernel(%arg0: i32, %arg1: memref<256x128xf32, #tpu.memory_space<vmem>>, %arg2: memref<128x8xf32, #tpu.memory_space<vmem>>, %arg3: memref<256x8xf32, #tpu.memory_space<vmem>>) attributes {dimension_semantics = [#tpu.dimension_semantics<parallel>], iteration_bounds = array<i64: 2>, scalar_prefetch = 0 : i64, scratch_operands = 0 : i64, tpu.core_type = #tpu.core_type<tc>, window_params = [{transform_indices = @transform_0, window_bounds = array<i64: 256, 128>}, {pipeline_mode = #tpu.pipeline_mode<synchronous>, transform_indices = @transform_1, window_bounds = array<i64: 128, 8>}, {transform_indices = @transform_2, window_bounds = array<i64: 256, 8>}]} {
    %c0 = arith.constant 0 : index
    %c0_0 = arith.constant 0 : index
    %0 = vector.load %arg1[%c0, %c0_0] : memref<256x128xf32, #tpu.memory_space<vmem>>, vector<256x128xf32>
    %c0_1 = arith.constant 0 : index
    %c0_2 = arith.constant 0 : index
    %1 = vector.load %arg2[%c0_1, %c0_2] : memref<128x8xf32, #tpu.memory_space<vmem>>, vector<128x8xf32>
    %cst = arith.constant dense<0.000000e+00> : vector<256x8xf32>
    %2 = tpu.matmul %0, %1, %cst {dimension_numbers = #tpu.dot_dimension_numbers<[1], [0], [0], [1], [0, 0, 1, 1], [], []>} : vector<256x128xf32>, vector<128x8xf32>, vector<256x8xf32> -> vector<256x8xf32>
    %c0_3 = arith.constant 0 : index
    %c0_4 = arith.constant 0 : index
    %3 = vector.load %arg3[%c0_3, %c0_4] : memref<256x8xf32, #tpu.memory_space<vmem>>, vector<256x8xf32>
    tpu.vector_store %arg3[%c0_3, %c0_4], %2 {strides = array<i32>} : memref<256x8xf32, #tpu.memory_space<vmem>>, vector<256x8xf32>,
    return
  }
  func.func @transform_0(%arg0: i32) -> (i32, i32) {
    %c0_i32 = arith.constant 0 : i32
    %c0_i32_0 = arith.constant 0 : i32
    return %arg0, %c0_i32 : i32, i32
  }
  func.func @transform_1(%arg0: i32) -> (i32, i32) {
    %c0_i32 = arith.constant 0 : i32
    %c0_i32_0 = arith.constant 0 : i32
    %c0_i32_1 = arith.constant 0 : i32
    return %c0_i32, %c0_i32_0 : i32, i32
  }
  func.func @transform_2(%arg0: i32) -> (i32, i32) {
    %c0_i32 = arith.constant 0 : i32
    %c0_i32_0 = arith.constant 0 : i32
    return %arg0, %c0_i32 : i32, i32
  }
}

</mosaic_0001>

<bundles_post_ra>
// kernel: linear_vector_readout.1
= control target key start
LH: loop header
LB: loop body
LE: loop exit
PB: predicated region body
PF: predicated region fallthrough
CT: control target
= control target key end

     0   :  { %s487_s9 = smov 0   ;;  %s661_s0 = inlined_call_operand.vmem [shape: f32[512,128], index: 0, kind: input, shape index: {}]   ;;  %s662_s1 = inlined_call_operand.vmem [shape: f32[128,8], index: 1, kind: input, shape index: {}]   ;;  %s663_s2 = inlined_call_operand.vmem [shape: f32[512,8], index: 2, kind: output, shape index: {}]  }
   0x1 LB: > { %s397_s10 = sadd.s32 4294967295, %s470_s9   ;;  %p401_p0 = scmp.ge.s32.totalorder %s470_s9, 1  ;;  %s470_s9 = sphi %s487_s9, %s12_s9  }
   0x2   : > { %p113_p1 = scmp.lt.s32.totalorder %s470_s9, 3 }
   0x4   : > { %p114_p2 = pnand %p401_p0, %p113_p1 }
   0x5   : > { %s402_s27 = sshll.u32 (!%p114_p2), %s397_s10, 5 }
   0x6   : > { %117 = sbr.rel (%p114_p2) target bundleno = 233 (0xe9), region = 28  ;;  %p136_p3 = scmp.lt.s32.totalorder (!%p114_p2), %s402_s27, 63 }
   0xb   : > { %v194_v0 = vld [vmem:[%s662_s1 + $0x78] sm:$0xff]  ;;  %v193_v1 = vld [vmem:[%s662_s1 + $0x70] sm:$0xff]  ;;  %v192_v2 = vld [vmem:[%s662_s1 + $0x68] sm:$0xff]  ;;  %s665_s27 = smov (!%p136_p3, %s402_s27), 63  ;;  %vm308_vm0 = vcmask 64512  }
   0xc   : > { %409 = vmatpush.msra.mxu2 %v194_v0  ;;  %410 = vmatpush.msra.mxu3 %v194_v0  ;;  %v191_v3 = vld [vmem:[%s662_s1 + $0x60] sm:$0xff]  ;;  %v190_v4 = vld [vmem:[%s662_s1 + $0x58] sm:$0xff]  ;;  %v189_v5 = vld [vmem:[%s662_s1 + $0x50] sm:$0xff]  ;;  %s403_s11 = sshll.u32 %s665_s27, 3 }
   0xd   : > { %195 = vmatpush.msra.mxu0 %v194_v0  ;;  %408 = vmatpush.msra.mxu1 %v194_v0  ;;  %v188_v6 = vld [vmem:[%s662_s1 + $0x48] sm:$0xff]  ;;  %v187_v7 = vld [vmem:[%s662_s1 + $0x40] sm:$0xff]  ;;  %v186_v8 = vld [vmem:[%s662_s1 + $0x38] sm:$0xff]  ;;  %s550_s18 = scalar_lea.vmem %s661_s0, %s403_s11  ;;  %s592_s23 = scalar_lea.vmem %s663_s2, %s403_s11 }
   0xe   : > { %412 = vmatpush.msra.mxu2 %v193_v1  ;;  %413 = vmatpush.msra.mxu3 %v193_v1  ;;  %v185_v9 = vld [vmem:[%s662_s1 + $0x30] sm:$0xff]  ;;  %v184_v10 = vld [vmem:[%s662_s1 + $0x28] sm:$0xff]  ;;  %v183_v11 = vld [vmem:[%s662_s1 + $0x20] sm:$0xff] }
   0xf   : > { %196 = vmatpush.msra.mxu0 %v193_v1  ;;  %411 = vmatpush.msra.mxu1 %v193_v1  ;;  %v182_v12 = vld [vmem:[%s662_s1 + $0x18] sm:$0xff]  ;;  %v181_v13 = vld [vmem:[%s662_s1 + $0x10] sm:$0xff]  ;;  %v180_v14 = vld [vmem:[%s662_s1 + $0x8] sm:$0xff] }
  0x10   : > { %415 = vmatpush.msra.mxu2 %v192_v2  ;;  %416 = vmatpush.msra.mxu3 %v192_v2  ;;  %v179_v15 = vld [vmem:[%s662_s1] sm:$0xff]  ;;  %v164_v20 = vld [vmem:[%s550_s18 + $0x88] sm:$0xff]  ;;  %v165_v24 = vld [vmem:[%s550_s18 + $0x90] sm:$0xff] }
  0x11   : > { %197 = vmatpush.msra.mxu0 %v192_v2  ;;  %414 = vmatpush.msra.mxu1 %v192_v2  ;;  %v163_v16 = vld [vmem:[%s550_s18 + $0x80] sm:$0xff]  ;;  %v172_v21 = vld [vmem:[%s550_s18 + $0xc8] sm:$0xff]  ;;  %v173_v25 = vld [vmem:[%s550_s18 + $0xd0] sm:$0xff] }
  0x12   : > { %418 = vmatpush.msra.mxu2 %v191_v3  ;;  %419 = vmatpush.msra.mxu3 %v191_v3  ;;  %v171_v17 = vld [vmem:[%s550_s18 + $0xc0] sm:$0xff]  ;;  %v148_v22 = vld [vmem:[%s550_s18 + $0x8] sm:$0xff]  ;;  %v149_v26 = vld [vmem:[%s550_s18 + $0x10] sm:$0xff] }
  0x13   : > { %198 = vmatpush.msra.mxu0 %v191_v3  ;;  %417 = vmatpush.msra.mxu1 %v191_v3  ;;  %v147_v18 = vld [vmem:[%s550_s18] sm:$0xff]  ;;  %v156_v23 = vld [vmem:[%s550_s18 + $0x48] sm:$0xff]  ;;  %v157_v27 = vld [vmem:[%s550_s18 + $0x50] sm:$0xff] }
  0x14   : > { %421 = vmatpush.msra.mxu2 %v190_v4  ;;  %422 = vmatpush.msra.mxu3 %v190_v4  ;;  %v155_v19 = vld [vmem:[%s550_s18 + $0x40] sm:$0xff]  ;;  %v166_v28 = vld [vmem:[%s550_s18 + $0x98] sm:$0xff]  ;;  %v168_v36 = vld [vmem:[%s550_s18 + $0xa8] sm:$0xff] }
  0x15   : > { %199 = vmatpush.msra.mxu0 %v190_v4  ;;  %420 = vmatpush.msra.mxu1 %v190_v4  ;;  %v174_v29 = vld [vmem:[%s550_s18 + $0xd8] sm:$0xff]  ;;  %v167_v32 = vld [vmem:[%s550_s18 + $0xa0] sm:$0xff]  ;;  %v176_v37 = vld [vmem:[%s550_s18 + $0xe8] sm:$0xff] }
  0x16   : > { %424 = vmatpush.msra.mxu2 %v189_v5  ;;  %425 = vmatpush.msra.mxu3 %v189_v5  ;;  %v150_v30 = vld [vmem:[%s550_s18 + $0x18] sm:$0xff]  ;;  %v175_v33 = vld [vmem:[%s550_s18 + $0xe0] sm:$0xff]  ;;  %v152_v38 = vld [vmem:[%s550_s18 + $0x28] sm:$0xff] }
  0x17   : > { %200 = vmatpush.msra.mxu0 %v189_v5  ;;  %423 = vmatpush.msra.mxu1 %v189_v5  ;;  %v158_v31 = vld [vmem:[%s550_s18 + $0x58] sm:$0xff]  ;;  %v151_v34 = vld [vmem:[%s550_s18 + $0x20] sm:$0xff]  ;;  %v160_v39 = vld [vmem:[%s550_s18 + $0x68] sm:$0xff] }
  0x18   : > { %427 = vmatpush.msra.mxu2 %v188_v6  ;;  %428 = vmatpush.msra.mxu3 %v188_v6  ;;  %v159_v35 = vld [vmem:[%s550_s18 + $0x60] sm:$0xff]  ;;  %v169_v40 = vld [vmem:[%s550_s18 + $0xb0] sm:$0xff]  ;;  %v170_v44 = vld [vmem:[%s550_s18 + $0xb8] sm:$0xff] }
  0x19   : > { %201 = vmatpush.msra.mxu0 %v188_v6  ;;  %426 = vmatpush.msra.mxu1 %v188_v6  ;;  %v177_v41 = vld [vmem:[%s550_s18 + $0xf0] sm:$0xff]  ;;  %v178_v45 = vld [vmem:[%s550_s18 + $0xf8] sm:$0xff] }
  0x1a   : > { %430 = vmatpush.msra.mxu2 %v187_v7  ;;  %431 = vmatpush.msra.mxu3 %v187_v7  ;;  %v153_v42 = vld [vmem:[%s550_s18 + $0x30] sm:$0xff]  ;;  %v154_v46 = vld [vmem:[%s550_s18 + $0x38] sm:$0xff] }
  0x1b   : > { %202 = vmatpush.msra.mxu0 %v187_v7  ;;  %429 = vmatpush.msra.mxu1 %v187_v7  ;;  %v161_v43 = vld [vmem:[%s550_s18 + $0x70] sm:$0xff]  ;;  %v162_v47 = vld [vmem:[%s550_s18 + $0x78] sm:$0xff] }
  0x1c   : > { %433 = vmatpush.msra.mxu2 %v186_v8  ;;  %434 = vmatpush.msra.mxu3 %v186_v8 }
  0x1d   : > { %203 = vmatpush.msra.mxu0 %v186_v8  ;;  %432 = vmatpush.msra.mxu1 %v186_v8 }
  0x1e   : > { %436 = vmatpush.msra.mxu2 %v185_v9  ;;  %437 = vmatpush.msra.mxu3 %v185_v9 }
  0x1f   : > { %204 = vmatpush.msra.mxu0 %v185_v9  ;;  %435 = vmatpush.msra.mxu1 %v185_v9 }
  0x20   : > { %439 = vmatpush.msra.mxu2 %v184_v10  ;;  %440 = vmatpush.msra.mxu3 %v184_v10 }
  0x21   : > { %205 = vmatpush.msra.mxu0 %v184_v10  ;;  %438 = vmatpush.msra.mxu1 %v184_v10 }
  0x22   : > { %442 = vmatpush.msra.mxu2 %v183_v11  ;;  %443 = vmatpush.msra.mxu3 %v183_v11 }
  0x23   : > { %206 = vmatpush.msra.mxu0 %v183_v11  ;;  %441 = vmatpush.msra.mxu1 %v183_v11 }
  0x24   : > { %445 = vmatpush.msra.mxu2 %v182_v12  ;;  %446 = vmatpush.msra.mxu3 %v182_v12 }
  0x25   : > { %207 = vmatpush.msra.mxu0 %v182_v12  ;;  %444 = vmatpush.msra.mxu1 %v182_v12 }
  0x26   : > { %448 = vmatpush.msra.mxu2 %v181_v13  ;;  %449 = vmatpush.msra.mxu3 %v181_v13 }
  0x27   : > { %208 = vmatpush.msra.mxu0 %v181_v13  ;;  %447 = vmatpush.msra.mxu1 %v181_v13 }
  0x28   : > { %451 = vmatpush.msra.mxu2 %v180_v14  ;;  %452 = vmatpush.msra.mxu3 %v180_v14 }
  0x29   : > { %209 = vmatpush.msra.mxu0 %v180_v14  ;;  %450 = vmatpush.msra.mxu1 %v180_v14 }
  0x2a   : > { %454 = vmatpush.msra.mxu2 %v179_v15  ;;  %455 = vmatpush.msra.mxu3 %v179_v15 }
  0x2b   : > { %259 = vmatmul.f32.vlgmr.msra.gmra.mxu2 %v163_v16  ;;  %283 = vmatmul.f32.vlgmr.msra.gmra.mxu3 %v171_v17 }
  0x2c   : > { %210 = vmatpush.msra.mxu0 %v179_v15  ;;  %453 = vmatpush.msra.mxu1 %v179_v15 }
  0x2d   : > { %211 = vmatmul.f32.vlgmr.msra.gmra.mxu0 %v147_v18  ;;  %235 = vmatmul.f32.vlgmr.msra.gmra.mxu1 %v155_v19 }
  0x33   : > { %262 = vmatmul.f32.gmra.mxu2 %v164_v20  ;;  %286 = vmatmul.f32.gmra.mxu3 %v172_v21 }
  0x35   : > { %214 = vmatmul.f32.gmra.mxu0 %v148_v22  ;;  %238 = vmatmul.f32.gmra.mxu1 %v156_v23 }
  0x3b   : > { %265 = vmatmul.f32.gmra.mxu2 %v165_v24  ;;  %289 = vmatmul.f32.gmra.mxu3 %v173_v25 }
  0x3d   : > { %217 = vmatmul.f32.gmra.mxu0 %v149_v26  ;;  %241 = vmatmul.f32.gmra.mxu1 %v157_v27 }
  0x43   : > { %268 = vmatmul.f32.gmra.mxu2 %v166_v28  ;;  %292 = vmatmul.f32.gmra.mxu3 %v174_v29 }
  0x45   : > { %220 = vmatmul.f32.gmra.mxu0 %v150_v30  ;;  %244 = vmatmul.f32.gmra.mxu1 %v158_v31 }
  0x4b   : > { %271 = vmatmul.f32.gmra.mxu2 %v167_v32  ;;  %295 = vmatmul.f32.gmra.mxu3 %v175_v33 }
  0x4d   : > { %223 = vmatmul.f32.gmra.mxu0 %v151_v34  ;;  %247 = vmatmul.f32.gmra.mxu1 %v159_v35 }
  0x53   : > { %274 = vmatmul.f32.gmra.mxu2 %v168_v36  ;;  %298 = vmatmul.f32.gmra.mxu3 %v176_v37 }
  0x55   : > { %226 = vmatmul.f32.gmra.mxu0 %v152_v38  ;;  %250 = vmatmul.f32.gmra.mxu1 %v160_v39 }
  0x5b   : > { %277 = vmatmul.f32.gmra.mxu2 %v169_v40  ;;  %301 = vmatmul.f32.gmra.mxu3 %v177_v41 }
  0x5d   : > { %229 = vmatmul.f32.gmra.mxu0 %v153_v42  ;;  %253 = vmatmul.f32.gmra.mxu1 %v161_v43 }
  0x63   : > { %280 = vmatmul.f32.gmra.mxu2 %v170_v44  ;;  %304 = vmatmul.f32.gmra.mxu3 %v178_v45 }
  0x65   : > { %232 = vmatmul.f32.gmra.mxu0 %v154_v46  ;;  %256 = vmatmul.f32.gmra.mxu1 %v162_v47 }
  0xaa   : > { %v212_v48 = vpop.f32.mrf.mxu0  ;;  %v236_v49 = vpop.f32.mrf.mxu1 }
  0xab   : > { %309 = vst.msk [vmem:[%s592_s23] sm:$0xff] %vm308_vm0, %v212_v48 }
  0xac   : > { %317 = vst.msk [vmem:[%s592_s23 + $0x40] sm:$0xff] %vm308_vm0, %v236_v49 }
  0xae   : > { %v260_v50 = vpop.f32.mrf.mxu2  ;;  %v284_v51 = vpop.f32.mrf.mxu3 }
  0xaf   : > { %325 = vst.msk [vmem:[%s592_s23 + $0x80] sm:$0xff] %vm308_vm0, %v260_v50 }
  0xb0   : > { %333 = vst.msk [vmem:[%s592_s23 + $0xc0] sm:$0xff] %vm308_vm0, %v284_v51 }
  0xb2   : > { %v215_v52 = vpop.f32.mrf.mxu0  ;;  %v239_v53 = vpop.f32.mrf.mxu1 }
  0xb3   : > { %310 = vst.msk [vmem:[%s592_s23 + $0x8] sm:$0xff] %vm308_vm0, %v215_v52 }
  0xb4   : > { %318 = vst.msk [vmem:[%s592_s23 + $0x48] sm:$0xff] %vm308_vm0, %v239_v53 }
  0xb6   : > { %v263_v54 = vpop.f32.mrf.mxu2  ;;  %v287_v55 = vpop.f32.mrf.mxu3 }
  0xb7   : > { %326 = vst.msk [vmem:[%s592_s23 + $0x88] sm:$0xff] %vm308_vm0, %v263_v54 }
  0xb8   : > { %334 = vst.msk [vmem:[%s592_s23 + $0xc8] sm:$0xff] %vm308_vm0, %v287_v55 }
  0xba   : > { %v218_v56 = vpop.f32.mrf.mxu0  ;;  %v242_v57 = vpop.f32.mrf.mxu1 }
  0xbb   : > { %311 = vst.msk [vmem:[%s592_s23 + $0x10] sm:$0xff] %vm308_vm0, %v218_v56 }
  0xbc   : > { %319 = vst.msk [vmem:[%s592_s23 + $0x50] sm:$0xff] %vm308_vm0, %v242_v57 }
  0xbe   : > { %v266_v58 = vpop.f32.mrf.mxu2  ;;  %v290_v59 = vpop.f32.mrf.mxu3 }
  0xbf   : > { %327 = vst.msk [vmem:[%s592_s23 + $0x90] sm:$0xff] %vm308_vm0, %v266_v58 }
  0xc0   : > { %335 = vst.msk [vmem:[%s592_s23 + $0xd0] sm:$0xff] %vm308_vm0, %v290_v59 }
  0xc2   : > { %v221_v60 = vpop.f32.mrf.mxu0  ;;  %v245_v61 = vpop.f32.mrf.mxu1 }
  0xc3   : > { %312 = vst.msk [vmem:[%s592_s23 + $0x18] sm:$0xff] %vm308_vm0, %v221_v60 }
  0xc4   : > { %320 = vst.msk [vmem:[%s592_s23 + $0x58] sm:$0xff] %vm308_vm0, %v245_v61 }
  0xc6   : > { %v269_v62 = vpop.f32.mrf.mxu2  ;;  %v293_v63 = vpop.f32.mrf.mxu3 }
  0xc7   : > { %328 = vst.msk [vmem:[%s592_s23 + $0x98] sm:$0xff] %vm308_vm0, %v269_v62 }
  0xc8   : > { %336 = vst.msk [vmem:[%s592_s23 + $0xd8] sm:$0xff] %vm308_vm0, %v293_v63 }
  0xca   : > { %v224_v0 = vpop.f32.mrf.mxu0  ;;  %v248_v1 = vpop.f32.mrf.mxu1 }
  0xcb   : > { %313 = vst.msk [vmem:[%s592_s23 + $0x20] sm:$0xff] %vm308_vm0, %v224_v0 }
  0xcc   : > { %321 = vst.msk [vmem:[%s592_s23 + $0x60] sm:$0xff] %vm308_vm0, %v248_v1 }
  0xce   : > { %v272_v2 = vpop.f32.mrf.mxu2  ;;  %v296_v3 = vpop.f32.mrf.mxu3 }
  0xcf   : > { %329 = vst.msk [vmem:[%s592_s23 + $0xa0] sm:$0xff] %vm308_vm0, %v272_v2 }
  0xd0   : > { %337 = vst.msk [vmem:[%s592_s23 + $0xe0] sm:$0xff] %vm308_vm0, %v296_v3 }
  0xd2   : > { %v227_v4 = vpop.f32.mrf.mxu0  ;;  %v251_v5 = vpop.f32.mrf.mxu1 }
  0xd3   : > { %314 = vst.msk [vmem:[%s592_s23 + $0x28] sm:$0xff] %vm308_vm0, %v227_v4 }
  0xd4   : > { %322 = vst.msk [vmem:[%s592_s23 + $0x68] sm:$0xff] %vm308_vm0, %v251_v5 }
  0xd6   : > { %v275_v6 = vpop.f32.mrf.mxu2  ;;  %v299_v7 = vpop.f32.mrf.mxu3 }
  0xd7   : > { %330 = vst.msk [vmem:[%s592_s23 + $0xa8] sm:$0xff] %vm308_vm0, %v275_v6 }
  0xd8   : > { %338 = vst.msk [vmem:[%s592_s23 + $0xe8] sm:$0xff] %vm308_vm0, %v299_v7 }
  0xda   : > { %v230_v8 = vpop.f32.mrf.mxu0  ;;  %v254_v9 = vpop.f32.mrf.mxu1 }
  0xdb   : > { %315 = vst.msk [vmem:[%s592_s23 + $0x30] sm:$0xff] %vm308_vm0, %v230_v8 }
  0xdc   : > { %323 = vst.msk [vmem:[%s592_s23 + $0x70] sm:$0xff] %vm308_vm0, %v254_v9 }
  0xde   : > { %v278_v10 = vpop.f32.mrf.mxu2  ;;  %v302_v11 = vpop.f32.mrf.mxu3 }
  0xdf   : > { %331 = vst.msk [vmem:[%s592_s23 + $0xb0] sm:$0xff] %vm308_vm0, %v278_v10 }
  0xe0   : > { %339 = vst.msk [vmem:[%s592_s23 + $0xf0] sm:$0xff] %vm308_vm0, %v302_v11 }
  0xe2   : > { %v233_v12 = vpop.f32.mrf.mxu0  ;;  %v257_v13 = vpop.f32.mrf.mxu1 }
  0xe3   : > { %316 = vst.msk [vmem:[%s592_s23 + $0x38] sm:$0xff] %vm308_vm0, %v233_v12 }
  0xe4   : > { %324 = vst.msk [vmem:[%s592_s23 + $0x78] sm:$0xff] %vm308_vm0, %v257_v13 }
  0xe6   : > { %v281_v14 = vpop.f32.mrf.mxu2  ;;  %v305_v15 = vpop.f32.mrf.mxu3 }
  0xe7   : > { %332 = vst.msk [vmem:[%s592_s23 + $0xb8] sm:$0xff] %vm308_vm0, %v281_v14 }
  0xe8   : > { %340 = vst.msk [vmem:[%s592_s23 + $0xf8] sm:$0xff] %vm308_vm0, %v305_v15 }
  0xe9 PF: > { %s12_s9 = sadd.s32 1, %s470_s9  }
  0xea   : > { %p9_p4 = scmp.ge.s32.totalorder %s12_s9, 4  }
  0xec   :  { %11 = sbr.rel (!%p9_p4) target bundleno = 1 (0x1), region = 58 }

</bundles_post_ra>
